<compile_context>
chip_gen: v7x
topology: tpu7x:2x2x1
jax: 0.10.0
libtpu: 0.0.40
codegen_flags: <defaults>
</compile_context>

<pallas_src>
import math
import functools
import numpy as np

import jax
import jax.numpy as jnp
from jax.experimental import pallas as pl
from jax.experimental.pallas import tpu as pltpu

F32 = jnp.float32
BF16 = jnp.bfloat16
LN_EPS = 1e-5
HIGHEST = jax.lax.Precision.HIGHEST   # reference path only


# ----------------------------------------------------------------------------
# Fused layer kernel (single invocation, everything VMEM-resident)
# ----------------------------------------------------------------------------
def fused_layer_kernel(x_ref, wqkv_ref, bqkv_ref, wo_ref, bo_ref,
                       ln1g_ref, ln1b_ref, ln2g_ref, ln2b_ref,
                       w1_ref, b1_ref, w2_ref, b2_ref,
                       seg_ref, segt_ref, o_ref,
                       *, n_batch, seq_len, n_embd, eps):

    def mxu(a, w_bf16):
        # Activations cast to bf16 at the MXU boundary; weights are pre-cast
        # host-side.  Single bf16 pass with f32 accumulation.
        return jnp.dot(a.astype(BF16), w_bf16, preferred_element_type=jnp.float32)

    E = n_embd
    T = n_batch * seq_len
    x = x_ref[...]                                    # (T, E) f32, t = b*S + s

    seg = seg_ref[...]                                # (E, H) bf16 0/1 head mask
    segt = segt_ref[...]                              # (H, E) bf16 0/1

    # ---- fused QKV projection (rotary + 1/sqrt(Dh) scale pre-folded) --------
    qkv = mxu(x, wqkv_ref[...]) + bqkv_ref[...]       # (T, 4E); last E is pad
    q = qkv[:, :E]
    k = qkv[:, E:2 * E]
    v = qkv[:, 2 * E:3 * E]

    # ---- multi-head attention over the ORIGINAL BATCH axis ------------------
    # Keys/values belonging to batch offset jb are the rows rolled by jb*S
    # (XLU sublane rotate; for B=2, shift 8 on 16 rows is direction-invariant).
    s_list, v_list = [], []
    for jb in range(n_batch):
        if jb == 0:
            k_j, v_j = k, v
        else:
            sh = (T - jb * seq_len) % T
            k_j = pltpu.roll(k, shift=sh, axis=0)
            v_j = pltpu.roll(v, shift=sh, axis=0)
        # per-head q.k via a segmented lane-sum on the MXU (stays lane-dense)
        s_list.append(mxu(q * k_j, seg))              # (T, H)
        v_list.append(v_j)

    # softmax over the n_batch key positions (order-invariant, max-subtracted)
    s_max = s_list[0]
    for s_j in s_list[1:]:
        s_max = jnp.maximum(s_max, s_j)
    e_list = [jnp.exp(s_j - s_max) for s_j in s_list]
    denom = e_list[0]
    for e_j in e_list[1:]:
        denom = denom + e_j
    inv = pl.reciprocal(denom, approx=True)           # (T, H), EUP slot

    # probabilities broadcast head -> lanes via segt (MXU); sum over key batches
    attn = mxu(e_list[0] * inv, segt) * v_list[0]
    for jb in range(1, n_batch):
        attn = attn + mxu(e_list[jb] * inv, segt) * v_list[jb]

    attn_out = mxu(attn, wo_ref[...]) + bo_ref[...]   # out_proj

    # ---- residual + LayerNorm 1 (dropout = identity, eval mode) -------------
    z = x + attn_out
    mu = jnp.mean(z, axis=-1, keepdims=True)
    zc = z - mu
    var = jnp.mean(zc * zc, axis=-1, keepdims=True)
    x1 = zc * jax.lax.rsqrt(var + eps) * ln1g_ref[...] + ln1b_ref[...]

    # ---- MLP: Linear -> GELU (tanh form) -> Linear ---------------------------
    # TODO(synk): nn.GELU() is the exact erf form; tanh form used per perf
    # review — deviation is far below the checked tolerance at these magnitudes.
    h = mxu(x1, w1_ref[...]) + b1_ref[...]            # (T, 4E)
    c0 = 0.7978845608028654                           # sqrt(2/pi)
    h = 0.5 * h * (1.0 + jnp.tanh(c0 * (h + 0.044715 * h * h * h)))
    m = mxu(h, w2_ref[...]) + b2_ref[...]             # (T, E)

    # ---- residual + LayerNorm 2 ----------------------------------------------
    z2 = x1 + m
    mu2 = jnp.mean(z2, axis=-1, keepdims=True)
    zc2 = z2 - mu2
    var2 = jnp.mean(zc2 * zc2, axis=-1, keepdims=True)
    o_ref[...] = zc2 * jax.lax.rsqrt(var2 + eps) * ln2g_ref[...] + ln2b_ref[...]


# ----------------------------------------------------------------------------
# Layer forward: one pallas_call, whole-array VMEM specs, no grid
# ----------------------------------------------------------------------------
def rotary_transformer_layer_forward(x, params):
    B, S, E = x.shape
    H = params["n_head"]
    assert S == H, "module's rotary broadcasting requires seq_len == n_head"
    T = B * S
    x2 = x.reshape(T, E)

    kernel = functools.partial(fused_layer_kernel,
                               n_batch=B, seq_len=S, n_embd=E, eps=LN_EPS)

    args = (x2, params["wqkv_t"], params["bqkv"], params["wo_t"], params["bo"],
            params["ln1_g"], params["ln1_b"], params["ln2_g"], params["ln2_b"],
            params["w1_t"], params["b1"], params["w2_t"], params["b2"],
            params["seg"], params["segT"])

    vmem = lambda: pl.BlockSpec(memory_space=pltpu.MemorySpace.VMEM)
    out = pl.pallas_call(
        kernel,
        out_shape=jax.ShapeDtypeStruct((T, E), F32),
        in_specs=[vmem() for _ in args],
        out_specs=vmem(),
    )(*args)
    return out.reshape(B, S, E)


# ----------------------------------------------------------------------------
# Deterministic parameter construction (shapes from the module's __init__)
# ----------------------------------------------------------------------------
def init_params(key, n_embd, n_head):
    E, H = n_embd, n_head
    Dh = E // H
    scale = 1.0 / math.sqrt(Dh)
    keys = jax.random.split(key, 12)

    def rnd(k, shape, s=0.02):
        return s * jax.random.normal(k, shape, F32)

    in_proj_w = rnd(keys[0], (3 * E, E))          # nn.MultiheadAttention.in_proj_weight
    in_proj_b = rnd(keys[1], (3 * E,), 0.01)      # in_proj_bias (config.bias=True)
    wq = np.asarray(in_proj_w[:E]);        bq = np.asarray(in_proj_b[:E])
    wk = np.asarray(in_proj_w[E:2 * E]);   bk = np.asarray(in_proj_b[E:2 * E])
    wv = np.asarray(in_proj_w[2 * E:]);    bv = np.asarray(in_proj_b[2 * E:])
    wo = np.asarray(rnd(keys[2], (E, E)));       bo = np.asarray(rnd(keys[3], (E,), 0.01))
    w1 = np.asarray(rnd(keys[4], (4 * E, E)));   b1 = np.asarray(rnd(keys[5], (4 * E,), 0.01))
    w2 = np.asarray(rnd(keys[6], (E, 4 * E)));   b2 = np.asarray(rnd(keys[7], (E,), 0.01))
    ln1_g = 1.0 + np.asarray(rnd(keys[8], (E,), 0.01));  ln1_b = np.asarray(rnd(keys[9], (E,), 0.01))
    ln2_g = 1.0 + np.asarray(rnd(keys[10], (E,), 0.01)); ln2_b = np.asarray(rnd(keys[11], (E,), 0.01))

    # rotary tables: emb = cat(freqs, freqs); the module's broadcast applies them
    # along the HEAD axis of (B, S, H, Dh) (valid iff seq_len == n_head)
    inv_freq = 1.0 / (10000.0 ** (np.arange(0, Dh, 2, dtype=np.float64) / Dh))
    t = np.arange(H, dtype=np.float64)
    freqs = t[:, None] * inv_freq[None, :]
    emb = np.concatenate([freqs, freqs], axis=-1)                     # (H, Dh)
    cos_flat = np.cos(emb).reshape(E)
    sin_flat = np.sin(emb).reshape(E)

    # signed permutation implementing rotate_half per head on the flat E dim
    P = np.zeros((E, E), np.float64)
    half = Dh // 2
    for h in range(H):
        for d in range(half):
            P[h * Dh + d + half, h * Dh + d] = -1.0   # out[..., :half] = -x[..., half:]
            P[h * Dh + d, h * Dh + d + half] = 1.0    # out[..., half:] =  x[..., :half]

    # rotary is linear: x_rot = x @ R with R = diag(cos) + P * sin (column scale)
    R = np.diag(cos_flat) + P * sin_flat[None, :]                     # (E, E) f64

    # fold rotary (and the 1/sqrt(Dh) score scale) into Wq / Wk; fuse QKV and
    # zero-pad the fused weight to 4E = 256 lanes for clean (8,128) tiling
    wq_t = wq.astype(np.float64).T
    wk_t = wk.astype(np.float64).T
    wv_t = wv.astype(np.float64).T
    wqkv_t = np.concatenate([(R @ wq_t) * scale, R @ wk_t, wv_t,
                             np.zeros((E, E), np.float64)], axis=1)   # (E, 4E)
    bqkv = np.concatenate([bq.astype(np.float64) * scale, bk, bv,
                           np.zeros((E,), np.float64)]).reshape(1, 4 * E)

    # 0/1 head-segment matrix: seg[e, h] = 1 iff embedding lane e belongs to head h
    seg = np.zeros((E, H), np.float32)
    for h in range(H):
        seg[h * Dh:(h + 1) * Dh, h] = 1.0

    bf16 = lambda a: jnp.asarray(np.asarray(a, np.float32), dtype=BF16)
    f32 = lambda a: jnp.asarray(np.asarray(a, np.float32))

    return dict(
        n_head=H,
        # ----- kernel operands (matmul weights pre-cast to bf16 host-side) ----
        wqkv_t=bf16(wqkv_t), bqkv=f32(bqkv),
        wo_t=bf16(wo.T), bo=f32(bo.reshape(1, E)),
        w1_t=bf16(w1.T), b1=f32(b1.reshape(1, 4 * E)),
        w2_t=bf16(w2.T), b2=f32(b2.reshape(1, E)),
        seg=bf16(seg), segT=bf16(np.ascontiguousarray(seg.T)),
        ln1_g=f32(ln1_g.reshape(1, E)), ln1_b=f32(ln1_b.reshape(1, E)),
        ln2_g=f32(ln2_g.reshape(1, E)), ln2_b=f32(ln2_b.reshape(1, E)),
        # ----- full-f32, unfused params (pure-JAX reference path only) --------
        rot_cos=f32(cos_flat.reshape(1, E)), rot_sin=f32(sin_flat.reshape(1, E)),
        rot_P=f32(P),
        wq_t_f32=f32(wq.T), wk_t_f32=f32(wk.T), wv_t_f32=f32(wv.T),
        bq=f32(bq.reshape(1, E)), bk=f32(bk.reshape(1, E)), bv=f32(bv.reshape(1, E)),
        wo_t_f32=f32(wo.T), w1_t_f32=f32(w1.T), w2_t_f32=f32(w2.T),
    )


# ----------------------------------------------------------------------------
# Pure-JAX reference (full f32, exact erf GELU, unfolded rotary) for sanity
# ----------------------------------------------------------------------------
def forward_reference(x, params):
    B, S, E = x.shape
    H = params["n_head"]
    Dh = E // H
    x2 = x.reshape(B * S, E)
    dot = lambda a, b: jnp.dot(a, b, precision=HIGHEST)

    xr = x2 * params["rot_cos"] + dot(x2, params["rot_P"]) * params["rot_sin"]
    q = dot(xr, params["wq_t_f32"]) + params["bq"]
    k = dot(xr, params["wk_t_f32"]) + params["bk"]
    v = dot(x2, params["wv_t_f32"]) + params["bv"]

    def to_heads(z):
        return jnp.transpose(z.reshape(B, S, H, Dh), (1, 2, 0, 3)).reshape(S * H, B, Dh)

    qh, kh, vh = map(to_heads, (q, k, v))
    s = jnp.einsum("gld,gmd->glm", qh, kh, precision=HIGHEST) / math.sqrt(Dh)
    p = jax.nn.softmax(s, axis=-1)
    oh = jnp.einsum("glm,gmd->gld", p, vh, precision=HIGHEST)
    o = jnp.transpose(oh.reshape(S, H, B, Dh), (2, 0, 1, 3)).reshape(B * S, E)
    attn_out = dot(o, params["wo_t_f32"]) + params["bo"]

    def ln(z, g, b):
        mu = jnp.mean(z, -1, keepdims=True)
        var = jnp.mean((z - mu) ** 2, -1, keepdims=True)
        return (z - mu) / jnp.sqrt(var + LN_EPS) * g + b

    x1 = ln(x2 + attn_out, params["ln1_g"], params["ln1_b"])
    hdn = dot(x1, params["w1_t_f32"]) + params["b1"]
    hdn = 0.5 * hdn * (1.0 + jax.scipy.special.erf(hdn / math.sqrt(2.0)))
    m = dot(hdn, params["w2_t_f32"]) + params["b2"]
    return ln(x1 + m, params["ln2_g"], params["ln2_b"]).reshape(B, S, E)


if __name__ == "__main__":
    # config: n_embd=64, n_head=8 (head_dim=8), dropout=0.0, bias=True
    # shapes: batch=2, seq=8 (seq == n_head required by the module's rotary broadcast)
    B, S, E, H = 2, 8, 64, 8
    key = jax.random.PRNGKey(0)
    pkey, xkey = jax.random.split(key)
    params = init_params(pkey, E, H)
    x = jax.random.normal(xkey, (B, S, E), F32)

    out = rotary_transformer_layer_forward(x, params)
    out = jax.block_until_ready(out)

    assert out.shape == (B, S, E)
    assert bool(jnp.all(jnp.isfinite(out)))
    ref = forward_reference(x, params)
    max_err = float(jnp.max(jnp.abs(out - ref)))
    # kernel: bf16 MXU matmuls (f32 accumulation), tanh-GELU, approx reciprocal
    # vs the f32 HIGHEST / exact-erf reference.  5e-3 is tight enough to catch
    # real regressions while leaving headroom for bf16 rounding.
    assert max_err < 5e-3, f"mismatch vs reference: {max_err}"
    print("KERNEL_OK")
</pallas_src>

<mosaic_0001>
module attributes {stable_mosaic.version = 11 : i64} {
  func.func @fused_layer_kernel(%arg0: memref<16x64xf32, #tpu.memory_space<vmem>>, %arg1: memref<64x256xbf16, #tpu.memory_space<vmem>>, %arg2: memref<1x256xf32, #tpu.memory_space<vmem>>, %arg3: memref<64x64xbf16, #tpu.memory_space<vmem>>, %arg4: memref<1x64xf32, #tpu.memory_space<vmem>>, %arg5: memref<1x64xf32, #tpu.memory_space<vmem>>, %arg6: memref<1x64xf32, #tpu.memory_space<vmem>>, %arg7: memref<1x64xf32, #tpu.memory_space<vmem>>, %arg8: memref<1x64xf32, #tpu.memory_space<vmem>>, %arg9: memref<64x256xbf16, #tpu.memory_space<vmem>>, %arg10: memref<1x256xf32, #tpu.memory_space<vmem>>, %arg11: memref<256x64xbf16, #tpu.memory_space<vmem>>, %arg12: memref<1x64xf32, #tpu.memory_space<vmem>>, %arg13: memref<64x8xbf16, #tpu.memory_space<vmem>>, %arg14: memref<8x64xbf16, #tpu.memory_space<vmem>>, %arg15: memref<16x64xf32, #tpu.memory_space<vmem>>) attributes {dimension_semantics = [], scalar_prefetch = 0 : i64, scratch_operands = 0 : i64, tpu.core_type = #tpu.core_type<tc>} {
    %c0 = arith.constant 0 : index
    %c0_0 = arith.constant 0 : index
    %0 = vector.load %arg0[%c0, %c0_0] : memref<16x64xf32, #tpu.memory_space<vmem>>, vector<16x64xf32>
    %c0_1 = arith.constant 0 : index
    %c0_2 = arith.constant 0 : index
    %1 = vector.load %arg13[%c0_1, %c0_2] : memref<64x8xbf16, #tpu.memory_space<vmem>>, vector<64x8xbf16>
    %c0_3 = arith.constant 0 : index
    %c0_4 = arith.constant 0 : index
    %2 = vector.load %arg14[%c0_3, %c0_4] : memref<8x64xbf16, #tpu.memory_space<vmem>>, vector<8x64xbf16>
    %c0_5 = arith.constant 0 : index
    %c0_6 = arith.constant 0 : index
    %3 = vector.load %arg1[%c0_5, %c0_6] : memref<64x256xbf16, #tpu.memory_space<vmem>>, vector<64x256xbf16>
    %4 = arith.truncf %0 : vector<16x64xf32> to vector<16x64xbf16>
    %cst = arith.constant dense<0.000000e+00> : vector<16x256xf32>
    %5 = tpu.matmul %4, %3, %cst {dimension_numbers = #tpu.dot_dimension_numbers<[1], [0], [0], [1], [0, 0, 1, 1], [], []>} : vector<16x64xbf16>, vector<64x256xbf16>, vector<16x256xf32> -> vector<16x256xf32>
    %c0_7 = arith.constant 0 : index
    %c0_8 = arith.constant 0 : index
    %6 = vector.load %arg2[%c0_7, %c0_8] : memref<1x256xf32, #tpu.memory_space<vmem>>, vector<1x256xf32>
    %7 = vector.broadcast %6 : vector<1x256xf32> to vector<16x256xf32>
    %8 = arith.addf %5, %7 : vector<16x256xf32>
    %9 = vector.extract_strided_slice %8 {offsets = [0, 0], sizes = [16, 64], strides = [1, 1]} : vector<16x256xf32> to vector<16x64xf32>
    %10 = vector.extract_strided_slice %8 {offsets = [0, 64], sizes = [16, 64], strides = [1, 1]} : vector<16x256xf32> to vector<16x64xf32>
    %11 = vector.extract_strided_slice %8 {offsets = [0, 128], sizes = [16, 64], strides = [1, 1]} : vector<16x256xf32> to vector<16x64xf32>
    %12 = arith.mulf %9, %10 : vector<16x64xf32>
    %13 = arith.truncf %12 : vector<16x64xf32> to vector<16x64xbf16>
    %cst_9 = arith.constant dense<0.000000e+00> : vector<16x8xf32>
    %14 = tpu.matmul %13, %1, %cst_9 {dimension_numbers = #tpu.dot_dimension_numbers<[1], [0], [0], [1], [0, 0, 1, 1], [], []>} : vector<16x64xbf16>, vector<64x8xbf16>, vector<16x8xf32> -> vector<16x8xf32>
    %c8_i32 = arith.constant 8 : i32
    %15 = tpu.dynamic_rotate %10 by %c8_i32 dim 0 : vector<16x64xf32>, i32 -> vector<16x64xf32>
    %c8_i32_10 = arith.constant 8 : i32
    %16 = tpu.dynamic_rotate %11 by %c8_i32_10 dim 0 : vector<16x64xf32>, i32 -> vector<16x64xf32>
    %17 = arith.mulf %9, %15 : vector<16x64xf32>
    %18 = arith.truncf %17 : vector<16x64xf32> to vector<16x64xbf16>
    %cst_11 = arith.constant dense<0.000000e+00> : vector<16x8xf32>
    %19 = tpu.matmul %18, %1, %cst_11 {dimension_numbers = #tpu.dot_dimension_numbers<[1], [0], [0], [1], [0, 0, 1, 1], [], []>} : vector<16x64xbf16>, vector<64x8xbf16>, vector<16x8xf32> -> vector<16x8xf32>
    %20 = arith.maximumf %14, %19 : vector<16x8xf32>
    %21 = arith.subf %14, %20 : vector<16x8xf32>
    %22 = math.exp %21 : vector<16x8xf32>
    %23 = arith.subf %19, %20 : vector<16x8xf32>
    %24 = math.exp %23 : vector<16x8xf32>
    %25 = arith.addf %22, %24 : vector<16x8xf32>
    %26 = tpu.reciprocal %25 {approx = true} : vector<16x8xf32> -> vector<16x8xf32>
    %27 = arith.mulf %22, %26 : vector<16x8xf32>
    %28 = arith.truncf %27 : vector<16x8xf32> to vector<16x8xbf16>
    %cst_12 = arith.constant dense<0.000000e+00> : vector<16x64xf32>
    %29 = tpu.matmul %28, %2, %cst_12 {dimension_numbers = #tpu.dot_dimension_numbers<[1], [0], [0], [1], [0, 0, 1, 1], [], []>} : vector<16x8xbf16>, vector<8x64xbf16>, vector<16x64xf32> -> vector<16x64xf32>
    %30 = arith.mulf %29, %11 : vector<16x64xf32>
    %31 = arith.mulf %24, %26 : vector<16x8xf32>
    %32 = arith.truncf %31 : vector<16x8xf32> to vector<16x8xbf16>
    %cst_13 = arith.constant dense<0.000000e+00> : vector<16x64xf32>
    %33 = tpu.matmul %32, %2, %cst_13 {dimension_numbers = #tpu.dot_dimension_numbers<[1], [0], [0], [1], [0, 0, 1, 1], [], []>} : vector<16x8xbf16>, vector<8x64xbf16>, vector<16x64xf32> -> vector<16x64xf32>
    %34 = arith.mulf %33, %16 : vector<16x64xf32>
    %35 = arith.addf %30, %34 : vector<16x64xf32>
    %c0_14 = arith.constant 0 : index
    %c0_15 = arith.constant 0 : index
    %36 = vector.load %arg3[%c0_14, %c0_15] : memref<64x64xbf16, #tpu.memory_space<vmem>>, vector<64x64xbf16>
    %37 = arith.truncf %35 : vector<16x64xf32> to vector<16x64xbf16>
    %cst_16 = arith.constant dense<0.000000e+00> : vector<16x64xf32>
    %38 = tpu.matmul %37, %36, %cst_16 {dimension_numbers = #tpu.dot_dimension_numbers<[1], [0], [0], [1], [0, 0, 1, 1], [], []>} : vector<16x64xbf16>, vector<64x64xbf16>, vector<16x64xf32> -> vector<16x64xf32>
    %c0_17 = arith.constant 0 : index
    %c0_18 = arith.constant 0 : index
    %39 = vector.load %arg4[%c0_17, %c0_18] : memref<1x64xf32, #tpu.memory_space<vmem>>, vector<1x64xf32>
    %40 = vector.broadcast %39 : vector<1x64xf32> to vector<16x64xf32>
    %41 = arith.addf %38, %40 : vector<16x64xf32>
    %42 = arith.addf %0, %41 : vector<16x64xf32>
    %cst_19 = arith.constant dense<0.000000e+00> : vector<16xf32>
    %43 = vector.multi_reduction <add>, %42, %cst_19 [1] : vector<16x64xf32> to vector<16xf32>
    %44 = vector.shape_cast %43 : vector<16xf32> to vector<16x1xf32>
    %cst_20 = arith.constant 6.400000e+01 : f32
    %45 = vector.broadcast %cst_20 : f32 to vector<16x1xf32>
    %46 = arith.divf %44, %45 : vector<16x1xf32>
    %47 = vector.broadcast %46 : vector<16x1xf32> to vector<16x64xf32>
    %48 = arith.subf %42, %47 : vector<16x64xf32>
    %49 = arith.mulf %48, %48 : vector<16x64xf32>
    %cst_21 = arith.constant dense<0.000000e+00> : vector<16xf32>
    %50 = vector.multi_reduction <add>, %49, %cst_21 [1] : vector<16x64xf32> to vector<16xf32>
    %51 = vector.shape_cast %50 : vector<16xf32> to vector<16x1xf32>
    %cst_22 = arith.constant 6.400000e+01 : f32
    %52 = vector.broadcast %cst_22 : f32 to vector<16x1xf32>
    %53 = arith.divf %51, %52 : vector<16x1xf32>
    %cst_23 = arith.constant 9.99999974E-6 : f32
    %54 = vector.broadcast %cst_23 : f32 to vector<16x1xf32>
    %55 = arith.addf %53, %54 : vector<16x1xf32>
    %56 = math.rsqrt %55 : vector<16x1xf32>
    %57 = vector.broadcast %56 : vector<16x1xf32> to vector<16x64xf32>
    %58 = arith.mulf %48, %57 : vector<16x64xf32>
    %c0_24 = arith.constant 0 : index
    %c0_25 = arith.constant 0 : index
    %59 = vector.load %arg5[%c0_24, %c0_25] : memref<1x64xf32, #tpu.memory_space<vmem>>, vector<1x64xf32>
    %60 = vector.broadcast %59 : vector<1x64xf32> to vector<16x64xf32>
    %61 = arith.mulf %58, %60 : vector<16x64xf32>
    %c0_26 = arith.constant 0 : index
    %c0_27 = arith.constant 0 : index
    %62 = vector.load %arg6[%c0_26, %c0_27] : memref<1x64xf32, #tpu.memory_space<vmem>>, vector<1x64xf32>
    %63 = vector.broadcast %62 : vector<1x64xf32> to vector<16x64xf32>
    %64 = arith.addf %61, %63 : vector<16x64xf32>
    %c0_28 = arith.constant 0 : index
    %c0_29 = arith.constant 0 : index
    %65 = vector.load %arg9[%c0_28, %c0_29] : memref<64x256xbf16, #tpu.memory_space<vmem>>, vector<64x256xbf16>
    %66 = arith.truncf %64 : vector<16x64xf32> to vector<16x64xbf16>
    %cst_30 = arith.constant dense<0.000000e+00> : vector<16x256xf32>
    %67 = tpu.matmul %66, %65, %cst_30 {dimension_numbers = #tpu.dot_dimension_numbers<[1], [0], [0], [1], [0, 0, 1, 1], [], []>} : vector<16x64xbf16>, vector<64x256xbf16>, vector<16x256xf32> -> vector<16x256xf32>
    %c0_31 = arith.constant 0 : index
    %c0_32 = arith.constant 0 : index
    %68 = vector.load %arg10[%c0_31, %c0_32] : memref<1x256xf32, #tpu.memory_space<vmem>>, vector<1x256xf32>
    %69 = vector.broadcast %68 : vector<1x256xf32> to vector<16x256xf32>
    %70 = arith.addf %67, %69 : vector<16x256xf32>
    %cst_33 = arith.constant 5.000000e-01 : f32
    %71 = vector.broadcast %cst_33 : f32 to vector<16x256xf32>
    %72 = arith.mulf %71, %70 : vector<16x256xf32>
    %cst_34 = arith.constant 4.471500e-02 : f32
    %73 = vector.broadcast %cst_34 : f32 to vector<16x256xf32>
    %74 = arith.mulf %73, %70 : vector<16x256xf32>
    %75 = arith.mulf %74, %70 : vector<16x256xf32>
    %76 = arith.mulf %75, %70 : vector<16x256xf32>
    %77 = arith.addf %70, %76 : vector<16x256xf32>
    %cst_35 = arith.constant 0.797884583 : f32
    %78 = vector.broadcast %cst_35 : f32 to vector<16x256xf32>
    %79 = arith.mulf %78, %77 : vector<16x256xf32>
    %80 = math.tanh %79 : vector<16x256xf32>
    %cst_36 = arith.constant 1.000000e+00 : f32
    %81 = vector.broadcast %cst_36 : f32 to vector<16x256xf32>
    %82 = arith.addf %81, %80 : vector<16x256xf32>
    %83 = arith.mulf %72, %82 : vector<16x256xf32>
    %c0_37 = arith.constant 0 : index
    %c0_38 = arith.constant 0 : index
    %84 = vector.load %arg11[%c0_37, %c0_38] : memref<256x64xbf16, #tpu.memory_space<vmem>>, vector<256x64xbf16>
    %85 = arith.truncf %83 : vector<16x256xf32> to vector<16x256xbf16>
    %cst_39 = arith.constant dense<0.000000e+00> : vector<16x64xf32>
    %86 = tpu.matmul %85, %84, %cst_39 {dimension_numbers = #tpu.dot_dimension_numbers<[1], [0], [0], [1], [0, 0, 1, 1], [], []>} : vector<16x256xbf16>, vector<256x64xbf16>, vector<16x64xf32> -> vector<16x64xf32>
    %c0_40 = arith.constant 0 : index
    %c0_41 = arith.constant 0 : index
    %87 = vector.load %arg12[%c0_40, %c0_41] : memref<1x64xf32, #tpu.memory_space<vmem>>, vector<1x64xf32>
    %88 = vector.broadcast %87 : vector<1x64xf32> to vector<16x64xf32>
    %89 = arith.addf %86, %88 : vector<16x64xf32>
    %90 = arith.addf %64, %89 : vector<16x64xf32>
    %cst_42 = arith.constant dense<0.000000e+00> : vector<16xf32>
    %91 = vector.multi_reduction <add>, %90, %cst_42 [1] : vector<16x64xf32> to vector<16xf32>
    %92 = vector.shape_cast %91 : vector<16xf32> to vector<16x1xf32>
    %cst_43 = arith.constant 6.400000e+01 : f32
    %93 = vector.broadcast %cst_43 : f32 to vector<16x1xf32>
    %94 = arith.divf %92, %93 : vector<16x1xf32>
    %95 = vector.broadcast %94 : vector<16x1xf32> to vector<16x64xf32>
    %96 = arith.subf %90, %95 : vector<16x64xf32>
    %97 = arith.mulf %96, %96 : vector<16x64xf32>
    %cst_44 = arith.constant dense<0.000000e+00> : vector<16xf32>
    %98 = vector.multi_reduction <add>, %97, %cst_44 [1] : vector<16x64xf32> to vector<16xf32>
    %99 = vector.shape_cast %98 : vector<16xf32> to vector<16x1xf32>
    %cst_45 = arith.constant 6.400000e+01 : f32
    %100 = vector.broadcast %cst_45 : f32 to vector<16x1xf32>
    %101 = arith.divf %99, %100 : vector<16x1xf32>
    %cst_46 = arith.constant 9.99999974E-6 : f32
    %102 = vector.broadcast %cst_46 : f32 to vector<16x1xf32>
    %103 = arith.addf %101, %102 : vector<16x1xf32>
    %104 = math.rsqrt %103 : vector<16x1xf32>
    %105 = vector.broadcast %104 : vector<16x1xf32> to vector<16x64xf32>
    %106 = arith.mulf %96, %105 : vector<16x64xf32>
    %c0_47 = arith.constant 0 : index
    %c0_48 = arith.constant 0 : index
    %107 = vector.load %arg7[%c0_47, %c0_48] : memref<1x64xf32, #tpu.memory_space<vmem>>, vector<1x64xf32>
    %108 = vector.broadcast %107 : vector<1x64xf32> to vector<16x64xf32>
    %109 = arith.mulf %106, %108 : vector<16x64xf32>
    %c0_49 = arith.constant 0 : index
    %c0_50 = arith.constant 0 : index
    %110 = vector.load %arg8[%c0_49, %c0_50] : memref<1x64xf32, #tpu.memory_space<vmem>>, vector<1x64xf32>
    %111 = vector.broadcast %110 : vector<1x64xf32> to vector<16x64xf32>
    %112 = arith.addf %109, %111 : vector<16x64xf32>
    %c0_51 = arith.constant 0 : index
    %c0_52 = arith.constant 0 : index
    %113 = vector.load %arg15[%c0_51, %c0_52] : memref<16x64xf32, #tpu.memory_space<vmem>>, vector<16x64xf32>
    tpu.vector_store %arg15[%c0_51, %c0_52], %112 {strides = array<i32>} : memref<16x64xf32, #tpu.memory_space<vmem>>, vector<16x64xf32>,
    return
  }
}

</mosaic_0001>

<bundles_post_ra>
// kernel: tpu_custom_call.1
= control target key start
LH: loop header
LB: loop body
LE: loop exit
PB: predicated region body
PF: predicated region fallthrough
CT: control target
= control target key end

     0   :  { %v1185_v2 = vmov 0   ;;  %vm124_vm0 = vcmask 523264   ;;  %s1516_s0 = inlined_call_operand.vmem [shape: f32[16,64], index: 0, kind: input, shape index: {}]   ;;  %s1517_s1 = inlined_call_operand.vmem [shape: bf16[64,256], index: 1, kind: input, shape index: {}]   ;;  %s1518_s2 = inlined_call_operand.vmem [shape: f32[1,256], index: 2, kind: input, shape index: {}]   ;;  %s1519_s3 = inlined_call_operand.vmem [shape: bf16[64,64], index: 3, kind: input, shape index: {}]   ;;  %s1520_s4 = inlined_call_operand.vmem [shape: f32[1,64], index: 4, kind: input, shape index: {}]   ;;  %s1521_s5 = inlined_call_operand.vmem [shape: f32[1,64], index: 5, kind: input, shape index: {}]   ;;  %s1522_s6 = inlined_call_operand.vmem [shape: f32[1,64], index: 6, kind: input, shape index: {}]   ;;  %s1523_s7 = inlined_call_operand.vmem [shape: f32[1,64], index: 7, kind: input, shape index: {}]   ;;  %s1524_s8 = inlined_call_operand.vmem [shape: f32[1,64], index: 8, kind: input, shape index: {}]   ;;  %s1525_s9 = inlined_call_operand.vmem [shape: bf16[64,256], index: 9, kind: input, shape index: {}]   ;;  %s1526_s10 = inlined_call_operand.vmem [shape: f32[1,256], index: 10, kind: input, shape index: {}]   ;;  %s1527_s11 = inlined_call_operand.vmem [shape: bf16[256,64], index: 11, kind: input, shape index: {}]   ;;  %s1528_s12 = inlined_call_operand.vmem [shape: f32[1,64], index: 12, kind: input, shape index: {}]   ;;  %s1529_s13 = inlined_call_operand.vmem [shape: bf16[64,8], index: 13, kind: input, shape index: {}]   ;;  %s1530_s14 = inlined_call_operand.vmem [shape: bf16[8,64], index: 14, kind: input, shape index: {}]   ;;  %s1531_s15 = inlined_call_operand.hbm [shape: f32[16,64], index: 15, kind: output, shape index: {}]  }
   0x1   :  { %v1085_v0 = vld [vmem:[%s1517_s1 + $0x4] ss:$8 sps:$4 sm:$0xff]   ;;  %v1087_v1 = vld [vmem:[%s1517_s1] ss:$8 sps:$4 sm:$0xff]   ;;  %160 = vmatprep.mubr.bf16.mxu1 %v1185_v2  ;;  %v1088_v3 = vld [vmem:[%s1517_s1 + $0x14] ss:$8 sps:$4 sm:$0xff]  }
   0x2   :  { %128 = vmatprep.subr.bf16.mxu1 %v1085_v0  ;;  %v1090_v4 = vld [vmem:[%s1517_s1 + $0x10] ss:$8 sps:$4 sm:$0xff]   ;;  %v1091_v5 = vld [vmem:[%s1517_s1 + $0x24] ss:$8 sps:$4 sm:$0xff]   ;;  %v1093_v6 = vld [vmem:[%s1517_s1 + $0x20] ss:$8 sps:$4 sm:$0xff]  }
   0x3   :  { %129 = vmatpush1.bf16.msra.mxu1 %v1087_v1  ;;  %v1094_v7 = vld [vmem:[%s1517_s1 + $0x34] ss:$8 sps:$4 sm:$0xff]   ;;  %v1096_v8 = vld [vmem:[%s1517_s1 + $0x30] ss:$8 sps:$4 sm:$0xff]   ;;  %v1300_v9 = vld [vmem:[%s1516_s0] sm:$0xff] }
   0x4   :  { %130 = vmatprep.subr.bf16.mxu1 %v1088_v3  ;;  %v1305_v10 = vld [vmem:[%s1516_s0 + $0x8] sm:$0xff] }
   0x5   :  { %v71_v11 = vpack.c.bf16 %v1305_v10, %v1300_v9 }
   0x7   :  { %131 = vmatpush1.bf16.msra.mxu1 %v1090_v4 }
   0x8   :  { %132 = vmatprep.subr.bf16.mxu1 %v1091_v5 }
   0xb   :  { %133 = vmatpush1.bf16.msra.mxu1 %v1093_v6 }
   0xc   :  { %134 = vmatprep.subr.bf16.mxu1 %v1094_v7 }
   0xf   :  { %135 = vmatpush1.bf16.msra.mxu1 %v1096_v8 }
  0x12   :  { %944 = vmatmul.mubr.msk.bf16.vlgmr.msra.gmra.mrb[0].mxu1 %vm124_vm0, %v71_v11 }
  0x13   :  { %20 = vsyncpa [#allocation3], 0  ;;  %v1097_v12 = vld [vmem:[%s1529_s13] sm:$0xff]   ;;  %v1186_v13 = vmov 0.0   ;;  %v1098_v14 = vld [vmem:[%s1529_s13 + $0x8] sm:$0xff]   ;;  %v74_v15 = vlaneseq  ;;  %vm1187_vm1 = vmmov 0  }
  0x14   :  { %1030 = vmatprep.subr.bf16.mxu1 %v1186_v13  ;;  %1042 = vmatprep.subr.bf16.mxu0 %v1186_v13  ;;  %v1099_v17 = vld [vmem:[%s1529_s13 + $0x10] sm:$0xff]   ;;  %v1100_v19 = vld [vmem:[%s1529_s13 + $0x18] sm:$0xff]   ;;  %v1336_v20 = vld [vmem:[%s1518_s2] sm:$0x3]  ;;  %s1188_s2 = smov 64   ;;  %vm322_vm2 = vcmask 1043456  }
  0x15   :  { %1031 = vmatpush3.bf16.msra.mxu1 %v1097_v12  ;;  %1043 = vmatpush3.bf16.msra.mxu0 %v1097_v12  ;;  %v1322_v16 = vshrl.u32 %v74_v15, 7  ;;  %v62_v36 = vld [vmem:[%s1530_s14] sm:$0xf]  ;;  %vm318_vm3 = vcmask 64512   ;;  %v1102_v8 = vld [vmem:[%s1519_s3 + $0x8] sm:$0xff]   ;;  %v1103_v11 = vld [vmem:[%s1519_s3 + $0x10] sm:$0xff]  }
  0x16   :  { %1032 = vmatprep.subr.bf16.mxu1 %v1186_v13  ;;  %1044 = vmatprep.subr.bf16.mxu0 %v1186_v13  ;;  %v324_v37 = vsel %vm322_vm2, %v62_v36, 0  ;;  %v1101_v7 = vld [vmem:[%s1519_s3] sm:$0xff]   ;;  %s1189_s29 = smov [#allocation2]  }
  0x17   :  { %v76_v18 = vsub.s32 0, %v1322_v16  ;;  %1038 = vmatprep.mubr.msk.bf16.mxu1 %vm1187_vm1, %v1186_v13  ;;  %1050 = vmatprep.mubr.msk.bf16.mxu0 %vm1187_vm1, %v1186_v13  ;;  %v80_v12 = vsub.s32 1, %v1322_v16  ;;  %s925_s30 = sshll.u32 %s1189_s29, 4  ;;  %s926_s30 = int_to_ptr.vmem [resolvable:$true] %s925_s30 }
  0x18   :  { %p1166_p1 = scmp.lt.s32.totalorder %s926_s30, %s926_s30 }
  0x19   :  { %1033 = vmatpush3.bf16.msra.mxu1 %v1098_v14  ;;  %1045 = vmatpush3.bf16.msra.mxu0 %v1098_v14  ;;  %v77_v21 = vrot.slane %v1336_v20, %v76_v18  ;;  %v81_v14 = vrot.slane %v1336_v20, %v80_v12  ;;  %v953_v20 = vld [vmem:[%s1520_s4] ss:$0 sm:$0xff] }
  0x1a   :  { %1034 = vmatprep.subr.bf16.mxu1 %v1186_v13  ;;  %1046 = vmatprep.subr.bf16.mxu0 %v1186_v13 }
  0x1d   :  { %1035 = vmatpush3.bf16.msra.mxu1 %v1099_v17  ;;  %1047 = vmatpush3.bf16.msra.mxu0 %v1099_v17 }
  0x1e   :  { %1036 = vmatprep.subr.bf16.mxu1 %v1186_v13  ;;  %1048 = vmatprep.subr.bf16.mxu0 %v1186_v13 }
  0x21   :  { %1037 = vmatpush3.bf16.msra.mxu1 %v1100_v19  ;;  %1049 = vmatpush3.bf16.msra.mxu0 %v1100_v19 }
  0x22   :  { %1054 = vmatprep.subr.bf16.mxu1 %v1186_v13  ;;  %1066 = vmatprep.subr.bf16.mxu0 %v1186_v13 }
  0xe5   :  { %v162_v22 = vpop.f32.mrb[0].mxu1 }
  0xe6   :  { %v163_v23 = vadd.f32 %v162_v22, %v77_v21  ;;  %v1347_v24 = vpop.f32.mrb[1].mxu1 }
  0xe7   :  { %v166_v25 = vpop.f32.mrb[2].mxu1  ;;  %v165_v15 = vadd.f32 %v1347_v24, %v81_v14 }
  0xe8   :  { %v1349_v26 = vpop.f32.mrb[3].mxu1  ;;  %173 = vrot.lane.b32.xlu0 %v163_v23, %s1188_s2  ;;  %v167_v27 = vadd.f32 %v166_v25, %v77_v21 }
  0xe9   :  { %v169_v19 = vadd.f32 %v1349_v26, %v81_v14 }
  0xec   :  { %175 = vrot.lane.b32.xlu0 %v167_v27, %s1188_s2  ;;  %s1161_s2 = scalar_lea.vmem %s926_s30, 256 }
  0xed   :  { %p1162_p0 = scmp.ne.s32.totalorder %s926_s30, %s1161_s2  ;;  %p1167_p2 = scmp.lt.s32.totalorder %s1161_s2, %s1161_s2 }
  0xef   :  { %p1168_p3 = por %p1167_p2, %p1166_p1 }
  0xf1   :  { %p1169_p4 = pnand %p1168_p3, %p1162_p0 }
 0x15a   :  { %v174_v28 = vpop.permute.xlu0 %173 }
 0x15b   :  { %v179_v30 = vmul.f32 %v174_v28, %v163_v23  ;;  %v251_v31 = vmul.f32 %v174_v28, %v167_v27 }
 0x15e   :  { %v176_v29 = vpop.permute.xlu0 %175 }
 0x15f   :  { %v180_v32 = vmul.f32 %v176_v29, %v167_v27  ;;  %v250_v33 = vmul.f32 %v176_v29, %v163_v23 }
 0x161   :  { %v181_v34 = vpack.c.bf16 %v180_v32, %v179_v30  ;;  %v252_v35 = vpack.c.bf16 %v251_v31, %v250_v33 }
 0x163   :  { %1039 = vmatmul.mubr.msk.bf16.vlgmr.msra.gmra.mrb[4].mxu1 %vm124_vm0, %v181_v34  ;;  %1051 = vmatmul.mubr.msk.bf16.vlgmr.msra.gmra.mrb[0].mxu0 %vm124_vm0, %v252_v35 }
 0x164   :  { %1056 = vmatprep.mubr.msk.bf16.mxu1 %vm1187_vm1, %v1186_v13  ;;  %1074 = vmatprep.mubr.msk.bf16.mxu0 %vm1187_vm1, %v1186_v13 }
 0x165   :  { %1055 = vmatpush3.bf16.msra.mxu1 %v324_v37  ;;  %1067 = vmatpush3.bf16.msra.mxu0 %v1101_v7 }
 0x166   :  { %1060 = vmatprep.subr.bf16.mxu1 %v1186_v13  ;;  %1068 = vmatprep.subr.bf16.mxu0 %v1186_v13 }
 0x169   :  { %1069 = vmatpush3.bf16.msra.mxu0 %v1102_v8 }
 0x16a   :  { %1070 = vmatprep.subr.bf16.mxu0 %v1186_v13 }
 0x16d   :  { %1071 = vmatpush3.bf16.msra.mxu0 %v1103_v11  ;;  %v960_v11 = vld [vmem:[%s1522_s6] ss:$0 sm:$0xff] }
 0x16e   :  { %1072 = vmatprep.subr.bf16.mxu0 %v1186_v13 }
 0x236   :  { %v243_v38 = vpop.f32.mrb[4].mxu1  ;;  %v290_v39 = vpop.f32.mrb[0].mxu0 }
 0x237   :  { %v297_v40 = vmax.f32 %v243_v38, %v290_v39  ;;  %v1040_v41 = vpop.f32.mrb[5].mxu1  ;;  %v1052_v42 = vpop.f32.mrb[1].mxu0 }
 0x238   :  { %v246_v43 = vpop.f32.mrb[6].mxu1  ;;  %v293_v44 = vpop.f32.mrb[2].mxu0 }
 0x239   :  { %v299_v45 = vsub.f32 %v243_v38, %v297_v40  ;;  %v305_v46 = vsub.f32 %v290_v39, %v297_v40  ;;  %v298_v47 = vmax.f32 %v246_v43, %v293_v44  ;;  %v1041_v48 = vpop.f32.mrb[7].mxu1  ;;  %v1053_v49 = vpop.f32.mrb[3].mxu0 }
 0x23b   :  { %v301_v50 = vmul.f32 1.442695, %v299_v45  ;;  %v307_v51 = vmul.f32 1.442695, %v305_v46  ;;  %v300_v52 = vsub.f32 %v246_v43, %v298_v47  ;;  %v306_v53 = vsub.f32 %v293_v44, %v298_v47 }
 0x23d   :  { %1133 = vpow2.f32 %v301_v50  ;;  %v303_v54 = vmul.f32 1.442695, %v300_v52  ;;  %v309_v55 = vmul.f32 1.442695, %v306_v53  ;;  %v1105_v53 = vld [vmem:[%s1525_s9] ss:$8 sps:$4 sm:$0xff]  }
 0x23e   :  { %1135 = vpow2.f32 %v307_v51 }
 0x23f   :  { %1137 = vpow2.f32 %v303_v54  ;;  %v1110_v54 = vld [vmem:[%s1525_s9 + $0x14] ss:$8 sps:$4 sm:$0xff]  }
 0x240   :  { %1139 = vpow2.f32 %v309_v55  ;;  %v1108_v55 = vld [vmem:[%s1525_s9 + $0x10] ss:$8 sps:$4 sm:$0xff]  }
 0x247   :  { %v1134_v56 = vpop.eup %1133 }
 0x248   :  { %v1136_v57 = vpop.eup %1135 }
 0x249   :  { %v1138_v58 = vpop.eup %1137  ;;  %v311_v59 = vadd.f32 %v1136_v57, %v1134_v56 }
 0x24a   :  { %v1140_v60 = vpop.eup %1139 }
 0x24b   :  { %1141 = vrcp.f32 %v311_v59  ;;  %v312_v61 = vadd.f32 %v1140_v60, %v1138_v58  ;;  %v1116_v59 = vld [vmem:[%s1525_s9 + $0x34] ss:$8 sps:$4 sm:$0xff]  }
 0x24d   :  { %1143 = vrcp.f32 %v312_v61 }
 0x255   :  { %v1142_v62 = vpop.eup %1141 }
 0x256   :  { %v369_v63 = vmul.f32 %v1142_v62, %v1136_v57  ;;  %v315_v0 = vmul.f32 %v1142_v62, %v1134_v56  ;;  %v1113_v56 = vld [vmem:[%s1525_s9 + $0x24] ss:$8 sps:$4 sm:$0xff]   ;;  %v1111_v57 = vld [vmem:[%s1525_s9 + $0x20] ss:$8 sps:$4 sm:$0xff]  }
 0x257   :  { %v1144_v1 = vpop.eup %1143 }
 0x258   :  { %v370_v3 = vmul.f32 %v1144_v1, %v1140_v60  ;;  %v316_v4 = vmul.f32 %v1144_v1, %v1138_v58  ;;  %v1114_v58 = vld [vmem:[%s1525_s9 + $0x30] ss:$8 sps:$4 sm:$0xff]  }
 0x25a   :  { %v317_v5 = vpack.c.bf16 %v316_v4, %v315_v0  ;;  %v371_v6 = vpack.c.bf16 %v370_v3, %v369_v63 }
 0x25c   :  { %1057 = vmatmul.mubr.msk.bf16.vlgmr.msra.gmra.mrb[8].mxu1 %vm318_vm3, %v317_v5  ;;  %v959_v5 = vld [vmem:[%s1521_s5] ss:$0 sm:$0xff] }
 0x25d   :  { %1061 = vmatpush3.bf16.msra.mxu1 %v324_v37  ;;  %1062 = vmatprep.mubr.msk.bf16.mxu1 %vm1187_vm1, %v1186_v13 }
 0x264   :  { %1063 = vmatmul.mubr.msk.bf16.vlgmr.msra.gmra.mrb[12].mxu1 %vm318_vm3, %v371_v6 }
 0x265   :  { %647 = vmatprep.mubr.bf16.mxu1 %v1185_v2  ;;  %v1104_v2 = vld [vmem:[%s1519_s3 + $0x18] sm:$0xff]  }
 0x266   :  { %1073 = vmatpush3.bf16.msra.mxu0 %v1104_v2 }
 0x32f   :  { %v360_v17 = vpop.f32.mrb[8].mxu1 }
 0x330   :  { %v367_v21 = vmul.f32 %v360_v17, %v165_v15  ;;  %v1058_v22 = vpop.f32.mrb[9].mxu1 }
 0x331   :  { %v363_v23 = vpop.f32.mrb[10].mxu1  ;;  %v1119_v22 = vld [vmem:[%s1527_s11 + $0x48] sm:$0xff]  }
 0x332   :  { %v368_v13 = vmul.f32 %v363_v23, %v169_v19  ;;  %v1059_v25 = vpop.f32.mrb[11].mxu1  ;;  %v1120_v23 = vld [vmem:[%s1527_s11 + $0x8] sm:$0xff]  }
 0x333   :  { %v1122_v25 = vld [vmem:[%s1527_s11 + $0x10] sm:$0xff]  }
 0x337   :  { %v409_v27 = vpop.f32.mrb[12].mxu1 }
 0x338   :  { %v416_v28 = vmul.f32 %v409_v27, %v169_v19  ;;  %v1064_v29 = vpop.f32.mrb[13].mxu1  ;;  %v1117_v19 = vld [vmem:[%s1527_s11 + $0x40] sm:$0xff]   ;;  %v1123_v27 = vld [vmem:[%s1527_s11 + $0x58] sm:$0xff]  }
 0x339   :  { %v412_v30 = vpop.f32.mrb[14].mxu1  ;;  %1008 = vmatprep.subr.bf16.mxu0 %v1117_v19  ;;  %v1125_v29 = vld [vmem:[%s1527_s11 + $0x60] sm:$0xff]  }
 0x33a   :  { %v418_v31 = vadd.f32 %v416_v28, %v367_v21  ;;  %v417_v32 = vmul.f32 %v412_v30, %v165_v15  ;;  %v1065_v33 = vpop.f32.mrb[15].mxu1  ;;  %v1118_v21 = vld [vmem:[%s1527_s11] sm:$0xff]   ;;  %v1124_v28 = vld [vmem:[%s1527_s11 + $0x18] sm:$0xff]  }
 0x33b   :  { %v1126_v30 = vld [vmem:[%s1527_s11 + $0x20] sm:$0xff]   ;;  %v1129_v33 = vld [vmem:[%s1527_s11 + $0x70] sm:$0xff]  }
 0x33c   :  { %v419_v34 = vadd.f32 %v417_v32, %v368_v13  ;;  %v1121_v13 = vld [vmem:[%s1527_s11 + $0x50] sm:$0xff]   ;;  %v1128_v32 = vld [vmem:[%s1527_s11 + $0x28] sm:$0xff]  }
 0x33e   :  { %v428_v35 = vpack.c.bf16 %v419_v34, %v418_v31  ;;  %v1127_v31 = vld [vmem:[%s1527_s11 + $0x68] sm:$0xff]   ;;  %v1130_v34 = vld [vmem:[%s1527_s11 + $0x30] sm:$0xff]  }
 0x340   :  { %1075 = vmatmul.mubr.msk.bf16.vlgmr.msra.gmra.mrb[4].mxu0 %vm124_vm0, %v428_v35  ;;  %v1131_v35 = vld [vmem:[%s1527_s11 + $0x78] sm:$0xff]  }
 0x341   :  { %1009 = vmatpush3.bf16.msra.mxu0 %v1118_v21 }
 0x342   :  { %1010 = vmatprep.subr.bf16.mxu0 %v1119_v22 }
 0x345   :  { %1011 = vmatpush3.bf16.msra.mxu0 %v1120_v23 }
 0x346   :  { %1012 = vmatprep.subr.bf16.mxu0 %v1121_v13  ;;  %v970_v13 = vld [vmem:[%s1528_s12] ss:$0 sm:$0xff] }
 0x349   :  { %1013 = vmatpush3.bf16.msra.mxu0 %v1122_v25 }
 0x34a   :  { %1014 = vmatprep.subr.bf16.mxu0 %v1123_v27 }
 0x34d   :  { %1015 = vmatpush3.bf16.msra.mxu0 %v1124_v28 }
 0x34e   :  { %1016 = vmatprep.subr.bf16.mxu0 %v1125_v29 }
 0x351   :  { %1017 = vmatpush3.bf16.msra.mxu0 %v1126_v30 }
 0x352   :  { %1018 = vmatprep.subr.bf16.mxu0 %v1127_v31 }
 0x355   :  { %1019 = vmatpush3.bf16.msra.mxu0 %v1128_v32 }
 0x356   :  { %1020 = vmatprep.subr.bf16.mxu0 %v1129_v33 }
 0x359   :  { %1021 = vmatpush3.bf16.msra.mxu0 %v1130_v34 }
 0x35a   :  { %1022 = vmatprep.subr.bf16.mxu0 %v1131_v35 }
 0x413   :  { %v497_v24 = vpop.f32.mrb[4].mxu0 }
 0x414   :  { %v498_v26 = vadd.f32 %v953_v20, %v497_v24  ;;  %v1076_v36 = vpop.f32.mrb[5].mxu0  ;;  %v560_v24 = vld [vmem:[%s1526_s10] sm:$0x3] }
 0x415   :  { %v500_v37 = vpop.f32.mrb[6].mxu0  ;;  %v569_v36 = vrot.slane %v560_v24, %v80_v12 }
 0x416   :  { %v501_v38 = vadd.f32 %v953_v20, %v500_v37  ;;  %v1077_v39 = vpop.f32.mrb[7].mxu0  ;;  %v504_v40 = vadd.f32 %v498_v26, %v1300_v9  ;;  %v1132_v20 = vld [vmem:[%s1527_s11 + $0x38] sm:$0xff]   ;;  %v565_v26 = vrot.slane %v560_v24, %v76_v18 }
 0x417   :  { %1023 = vmatpush3.bf16.msra.mxu0 %v1132_v20 }
 0x418   :  { %v506_v41 = vsel %vm124_vm0, %v504_v40, 0.0  ;;  %v505_v42 = vadd.f32 %v501_v38, %v1305_v10  ;;  %v1107_v10 = vld [vmem:[%s1525_s9 + $0x4] ss:$8 sps:$4 sm:$0xff]  }
 0x419   :  { %507 = vadd.xlane.f32.xlu1 %v506_v41  ;;  %615 = vmatprep.subr.bf16.mxu1 %v1107_v10 }
 0x41a   :  { %v509_v43 = vsel %vm124_vm0, %v505_v42, 0.0  ;;  %616 = vmatpush1.bf16.msra.mxu1 %v1105_v53 }
 0x41b   :  { %617 = vmatprep.subr.bf16.mxu1 %v1110_v54 }
 0x41d   :  { %510 = vadd.xlane.f32.xlu1 %v509_v43 }
 0x41e   :  { %618 = vmatpush1.bf16.msra.mxu1 %v1108_v55 }
 0x41f   :  { %619 = vmatprep.subr.bf16.mxu1 %v1113_v56 }
 0x422   :  { %620 = vmatpush1.bf16.msra.mxu1 %v1111_v57 }
 0x423   :  { %621 = vmatprep.subr.bf16.mxu1 %v1116_v59 }
 0x426   :  { %622 = vmatpush1.bf16.msra.mxu1 %v1114_v58 }
 0x4a6   :  { %v508_v44 = vpop.xlane.xlu1 %507 }
 0x4a7   :  { %v513_v45 = vmul.f32 0.015625, %v508_v44 }
 0x4a9   :  { %v515_v46 = vsub.f32 %v504_v40, %v513_v45 }
 0x4aa   :  { %v511_v47 = vpop.xlane.xlu1 %510 }
 0x4ab   :  { %v514_v48 = vmul.f32 0.015625, %v511_v47  ;;  %v517_v49 = vmul.f32 %v515_v46, %v515_v46 }
 0x4ad   :  { %v516_v50 = vsub.f32 %v505_v42, %v514_v48  ;;  %v519_v51 = vsel %vm124_vm0, %v517_v49, 0.0 }
 0x4ae   :  { %520 = vadd.xlane.f32.xlu0 %v519_v51 }
 0x4af   :  { %v518_v52 = vmul.f32 %v516_v50, %v516_v50 }
 0x4b1   :  { %v522_v9 = vsel %vm124_vm0, %v518_v52, 0.0 }
 0x4b2   :  { %523 = vadd.xlane.f32.xlu1 %v522_v9 }
 0x53b   :  { %v521_v60 = vpop.xlane.xlu0 %520 }
 0x53c   :  { %v525_v61 = vmul.f32 0.015625, %v521_v60 }
 0x53e   :  { %v527_v62 = vadd.f32 1e-05, %v525_v61 }
 0x53f   :  { %v524_v63 = vpop.xlane.xlu1 %523 }
 0x540   :  { %1145 = vrsqrt.f32 %v527_v62  ;;  %v526_v0 = vmul.f32 0.015625, %v524_v63 }
 0x542   :  { %v528_v1 = vadd.f32 1e-05, %v526_v0 }
 0x544   :  { %1147 = vrsqrt.f32 %v528_v1 }
 0x54a   :  { %v1146_v3 = vpop.eup %1145 }
 0x54b   :  { %v531_v4 = vmul.f32 %v1146_v3, %v515_v46 }
 0x54d   :  { %v540_v7 = vmul.f32 %v959_v5, %v531_v4 }
 0x54e   :  { %v1148_v6 = vpop.eup %1147 }
 0x54f   :  { %v532_v8 = vmul.f32 %v1148_v6, %v516_v50  ;;  %v1425_v14 = vadd.f32 %v960_v11, %v540_v7 }
 0x551   :  { %v541_v2 = vmul.f32 %v959_v5, %v532_v8 }
 0x553   :  { %v1427_v15 = vadd.f32 %v960_v11, %v541_v2 }
 0x555   :  { %v559_v17 = vpack.c.bf16 %v1427_v15, %v1425_v14 }
 0x557   :  { %969 = vmatmul.mubr.msk.bf16.vlgmr.msra.gmra.mrb[16].mxu1 %vm124_vm0, %v559_v17 }
 0x62a   :  { %v649_v37 = vpop.f32.mrb[16].mxu1 }
 0x62b   :  { %v650_v38 = vadd.f32 %v649_v37, %v565_v26  ;;  %v651_v39 = vpop.f32.mrb[17].mxu1 }
 0x62c   :  { %v652_v40 = vadd.f32 %v651_v39, %v569_v36  ;;  %v653_v41 = vpop.f32.mrb[18].mxu1 }
 0x62d   :  { %v662_v42 = vmul.f32 0.044715, %v650_v38  ;;  %v654_v43 = vadd.f32 %v653_v41, %v565_v26  ;;  %v655_v44 = vpop.f32.mrb[19].mxu1  ;;  %v658_v3 = vmul.f32 0.5, %v650_v38 }
 0x62e   :  { %v663_v45 = vmul.f32 0.044715, %v652_v40  ;;  %v656_v46 = vadd.f32 %v655_v44, %v569_v36  ;;  %v659_v6 = vmul.f32 0.5, %v652_v40 }
 0x62f   :  { %v666_v47 = vmul.f32 %v662_v42, %v650_v38  ;;  %v664_v48 = vmul.f32 0.044715, %v654_v43  ;;  %v660_v4 = vmul.f32 0.5, %v654_v43 }
 0x630   :  { %v667_v49 = vmul.f32 %v663_v45, %v652_v40  ;;  %v665_v50 = vmul.f32 0.044715, %v656_v46  ;;  %v661_v7 = vmul.f32 0.5, %v656_v46 }
 0x631   :  { %v670_v51 = vmul.f32 %v666_v47, %v650_v38  ;;  %v668_v52 = vmul.f32 %v664_v48, %v654_v43 }
 0x632   :  { %v671_v18 = vmul.f32 %v667_v49, %v652_v40  ;;  %v669_v9 = vmul.f32 %v665_v50, %v656_v46  ;;  %v987_v49 = vld [vmem:[%s1523_s7] ss:$0 sm:$0xff] }
 0x633   :  { %v674_v16 = vadd.f32 %v670_v51, %v650_v38  ;;  %v672_v12 = vmul.f32 %v668_v52, %v654_v43  ;;  %v988_v51 = vld [vmem:[%s1524_s8] ss:$0 sm:$0xff] }
 0x634   :  { %v673_v10 = vmul.f32 %v669_v9, %v656_v46  ;;  %v675_v53 = vadd.f32 %v671_v18, %v652_v40 }
 0x635   :  { %v678_v54 = vmul.f32 0.7978846, %v674_v16  ;;  %v676_v55 = vadd.f32 %v672_v12, %v654_v43 }
 0x636   :  { %v677_v56 = vadd.f32 %v673_v10, %v656_v46  ;;  %v679_v57 = vmul.f32 0.7978846, %v675_v53 }
 0x637   :  { %1149 = vtanh.f32 %v678_v54  ;;  %v680_v58 = vmul.f32 0.7978846, %v676_v55 }
 0x638   :  { %v681_v59 = vmul.f32 0.7978846, %v677_v56  ;;  %1151 = vtanh.f32 %v679_v57 }
 0x639   :  { %1153 = vtanh.f32 %v680_v58 }
 0x63a   :  { %1155 = vtanh.f32 %v681_v59 }
 0x641   :  { %v1150_v60 = vpop.eup %1149 }
 0x642   :  { %v1152_v61 = vpop.eup %1151  ;;  %v686_v62 = vadd.f32 1.0, %v1150_v60 }
 0x643   :  { %v1154_v63 = vpop.eup %1153  ;;  %v687_v0 = vadd.f32 1.0, %v1152_v61 }
 0x644   :  { %v1156_v1 = vpop.eup %1155  ;;  %v688_v5 = vadd.f32 1.0, %v1154_v63  ;;  %v690_v11 = vmul.f32 %v686_v62, %v658_v3 }
 0x645   :  { %v689_v8 = vadd.f32 1.0, %v1156_v1  ;;  %v691_v17 = vmul.f32 %v687_v0, %v659_v6 }
 0x646   :  { %v692_v2 = vmul.f32 %v688_v5, %v660_v4 }
 0x647   :  { %v693_v19 = vmul.f32 %v689_v8, %v661_v7 }
 0x648   :  { %v726_v21 = vpack.c.bf16 %v692_v2, %v690_v11 }
 0x649   :  { %v727_v22 = vpack.c.bf16 %v693_v19, %v691_v17 }
 0x64b   :  { %863 = vmatprep.mubr.bf16.mxu0 %v727_v22 }
 0x64c   :  { %864 = vmatmul.mubr.bf16.vlgmr.msra.gmra.mrb[8].mxu0 %v726_v21 }
 0x71f   :  { %v1024_v23 = vpop.f32.mrb[8].mxu0 }
 0x720   :  { %v1025_v25 = vpop.f32.mrb[9].mxu0 }
 0x721   :  { %v1026_v27 = vadd.f32 %v1025_v25, %v1024_v23  ;;  %v1027_v28 = vpop.f32.mrb[10].mxu0 }
 0x722   :  { %v1028_v29 = vpop.f32.mrb[11].mxu0 }
 0x723   :  { %v866_v30 = vadd.f32 %v1026_v27, %v970_v13  ;;  %v1029_v31 = vadd.f32 %v1028_v29, %v1027_v28 }
 0x725   :  { %v869_v32 = vadd.f32 %v1029_v31, %v970_v13  ;;  %v872_v33 = vadd.f32 %v866_v30, %v1425_v14 }
 0x727   :  { %v874_v34 = vsel %vm124_vm0, %v872_v33, 0.0  ;;  %v873_v35 = vadd.f32 %v869_v32, %v1427_v15 }
 0x728   :  { %875 = vadd.xlane.f32.xlu1 %v874_v34 }
 0x729   :  { %v877_v20 = vsel %vm124_vm0, %v873_v35, 0.0 }
 0x72c   :  { %878 = vadd.xlane.f32.xlu1 %v877_v20 }
 0x7b5   :  { %v876_v24 = vpop.xlane.xlu1 %875 }
 0x7b6   :  { %v880_v26 = vmul.f32 0.015625, %v876_v24 }
 0x7b8   :  { %v882_v36 = vsub.f32 %v872_v33, %v880_v26 }
 0x7b9   :  { %v879_v37 = vpop.xlane.xlu1 %878 }
 0x7ba   :  { %v881_v38 = vmul.f32 0.015625, %v879_v37  ;;  %v884_v39 = vmul.f32 %v882_v36, %v882_v36 }
 0x7bc   :  { %v883_v40 = vsub.f32 %v873_v35, %v881_v38  ;;  %v886_v41 = vsel %vm124_vm0, %v884_v39, 0.0 }
 0x7bd   :  { %887 = vadd.xlane.f32.xlu1 %v886_v41 }
 0x7be   :  { %v885_v42 = vmul.f32 %v883_v40, %v883_v40 }
 0x7c0   :  { %v889_v14 = vsel %vm124_vm0, %v885_v42, 0.0 }
 0x7c1   :  { %890 = vadd.xlane.f32.xlu1 %v889_v14 }
 0x84a   :  { %v888_v43 = vpop.xlane.xlu1 %887 }
 0x84b   :  { %v892_v15 = vmul.f32 0.015625, %v888_v43 }
 0x84d   :  { %v894_v44 = vadd.f32 1e-05, %v892_v15 }
 0x84e   :  { %v891_v45 = vpop.xlane.xlu1 %890 }
 0x84f   :  { %1157 = vrsqrt.f32 %v894_v44  ;;  %v893_v46 = vmul.f32 0.015625, %v891_v45 }
 0x851   :  { %v895_v47 = vadd.f32 1e-05, %v893_v46 }
 0x853   :  { %1159 = vrsqrt.f32 %v895_v47 }
 0x859   :  { %v1158_v48 = vpop.eup %1157 }
 0x85a   :  { %v898_v50 = vmul.f32 %v1158_v48, %v882_v36 }
 0x85c   :  { %v907_v52 = vmul.f32 %v987_v49, %v898_v50 }
 0x85d   :  { %v1160_v18 = vpop.eup %1159 }
 0x85e   :  { %v899_v9 = vmul.f32 %v1160_v18, %v883_v40  ;;  %v916_v16 = vadd.f32 %v988_v51, %v907_v52 }
 0x860   :  { %v908_v12 = vmul.f32 %v987_v49, %v899_v9  ;;  %918 = vst.msk [vmem:[#allocation2] sm:$0xff] %vm124_vm0, %v916_v16 }
 0x862   :  { %v917_v10 = vadd.f32 %v988_v51, %v908_v12 }
 0x864   :  { %919 = vst.msk [vmem:[#allocation2 + $0x8] sm:$0xff] %vm124_vm0, %v917_v10 }
 0x865   :  { %1172 = shalt.err (!%p1169_p4)
}
 0x866   :  { %s1173_s13 = scalar_lea.hbm %s1531_s15, 256 }
 0x867   :  { %p1174_p5 = scmp.ne.s32.totalorder %s1531_s15, %s1173_s13  ;;  %p1177_p6 = scmp.lt.u32.totalorder %s1173_s13, %s1531_s15 }
 0x869   :  { %p1179_p7 = pnand %p1177_p6, %p1174_p5 }
 0x86b   :  { %1182 = shalt.err (!%p1179_p7)
}
 0x86c   :  { %s1190_s19 = smov 128   ;;  %s1191_s20 = smov 8  }
 0x86d   :  { %931 = dma.vmem_to_hbm [thread:$0]  %s926_s30, 256, %s1531_s15, [#allocation3], %s1190_s19, %s1190_s19, %s1191_s20  }
 0x86e   :  { %1183 = dma.done.wait [#allocation3], 256  }
 0x86f   :  { %1184 = vsyncadd [#allocation3], 4294967040 }
 0x870   :  { %935 = vsyncpa [#allocation3], 1 }

</bundles_post_ra>
